<compile_context>
chip_gen: v7x
topology: tpu7x:2x2x1
jax: 0.10.0
libtpu: 0.0.40
codegen_flags: <defaults>
</compile_context>

<pallas_src>
import functools
import math

import jax
import jax.numpy as jnp
from jax import lax
from jax.experimental import pallas as pl
from jax.experimental.pallas import tpu as pltpu

LANE_W = 512      # lane width of the flattened 2-D slab (multiple of 128)
MAX_TM = 512      # max rows per block: (512, 512) f32 tile = 1 MiB
NUM_SPLITS = 2    # leading "parallel" grid axis (both TensorCores on v7x)


def _local_mse_kernel(yhat_ref, y_ref, mask_ref, sse_ref, cnt_ref,
                      sse_acc, cnt_acc, *, tm, acc_rows, rows, bpc, needs_mask):
    c = pl.program_id(0)   # parallel split (core) index
    i = pl.program_id(1)   # reduction step within this split

    @pl.when(i == 0)
    def _():
        sse_acc[...] = jnp.zeros_like(sse_acc)
        cnt_acc[...] = jnp.zeros_like(cnt_acc)

    m = mask_ref[...].astype(jnp.float32)
    y = y_ref[...].astype(jnp.float32)
    yh = yhat_ref[...].astype(jnp.float32)

    d = (y - yh) * m          # == y*m - yhat*m, one multiply saved
    nz = m != 0.0

    if needs_mask:
        # Logical (unclamped) block index along the row axis: rows at or past
        # `rows` are padding / duplicated coverage and must not contribute.
        lb = c * bpc + i
        row_ids = lax.broadcasted_iota(jnp.int32, (tm, LANE_W), 0) + lb * tm
        valid = row_ids < rows
        d = jnp.where(valid, d, 0.0)
        nz = jnp.logical_and(valid, nz)

    sq = d * d
    cnt = nz.astype(jnp.float32)

    # Pure-VPU partial reduction onto a vreg-shaped accumulator; the expensive
    # cross-lane/sublane reduction happens only once, in the epilogue below.
    sse_acc[...] += jnp.sum(sq.reshape(tm // acc_rows, acc_rows, LANE_W), axis=0)
    cnt_acc[...] += jnp.sum(cnt.reshape(tm // acc_rows, acc_rows, LANE_W), axis=0)

    @pl.when(i == pl.num_programs(1) - 1)
    def _():
        sse_ref[...] = jnp.sum(sse_acc[...]).reshape(1, 1, 1)
        cnt_ref[...] = jnp.sum(cnt_acc[...]).reshape(1, 1, 1)


def local_mse_loss(yhat, y, mask):
    """Pallas implementation of LocalLoss(nn.MSELoss).forward(yhat, y, mask)."""
    assert yhat.shape == y.shape == mask.shape
    n = math.prod(yhat.shape)
    assert n > 0

    pad = (-n) % LANE_W

    def _flat2d(x):
        # Flatten in native dtype (no astype copy); reshape of a contiguous
        # array is free. Zero-pad only when n is not a multiple of LANE_W.
        x = x.reshape(-1)
        if pad:
            x = jnp.pad(x, (0, pad))
        return x.reshape(-1, LANE_W)

    yh2, y2, m2 = _flat2d(yhat), _flat2d(y), _flat2d(mask)
    rows = y2.shape[0]

    tm = MAX_TM if rows >= MAX_TM else rows        # full-extent block if small
    acc_rows = 8 if tm % 8 == 0 else tm
    nb = -(-rows // tm)                            # row-blocks in the slab
    bpc = -(-nb // NUM_SPLITS)                     # blocks per parallel split
    needs_mask = (NUM_SPLITS * bpc * tm) != rows

    def in_map(c, i):
        # Clamp over-covered block indices to a valid block; the kernel zeroes
        # their contribution via the row-validity mask.
        return (jnp.minimum(c * bpc + i, nb - 1), 0)

    tile_spec = pl.BlockSpec((tm, LANE_W), in_map)
    out_spec = pl.BlockSpec((1, 1, 1), lambda c, i: (c, 0, 0))

    kernel = functools.partial(
        _local_mse_kernel, tm=tm, acc_rows=acc_rows, rows=rows, bpc=bpc,
        needs_mask=needs_mask)

    sse, cnt = pl.pallas_call(
        kernel,
        out_shape=(jax.ShapeDtypeStruct((NUM_SPLITS, 1, 1), jnp.float32),
                   jax.ShapeDtypeStruct((NUM_SPLITS, 1, 1), jnp.float32)),
        grid_spec=pltpu.PrefetchScalarGridSpec(
            num_scalar_prefetch=0,
            grid=(NUM_SPLITS, bpc),
            in_specs=[tile_spec, tile_spec, tile_spec],
            out_specs=[out_spec, out_spec],
            scratch_shapes=[
                pltpu.VMEM((acc_rows, LANE_W), jnp.float32),  # running SSE
                pltpu.VMEM((acc_rows, LANE_W), jnp.float32),  # running count
            ],
        ),
        compiler_params=pltpu.CompilerParams(
            dimension_semantics=("parallel", "arbitrary")),
    )(yh2, y2, m2)

    # Combine per-split partials; inf/nan on an all-zero mask, like PyTorch.
    return jnp.sum(sse) / jnp.sum(cnt)


if __name__ == "__main__":
    key = jax.random.PRNGKey(0)
    k1, k2, k3 = jax.random.split(key, 3)

    N, C, H, W = 2, 4, 16, 16  # NCHW, as implied by the PyTorch module
    yhat = jax.random.normal(k1, (N, C, H, W), dtype=jnp.float32)
    y = jax.random.normal(k2, (N, C, H, W), dtype=jnp.float32)
    mask = (jax.random.uniform(k3, (N, C, H, W)) > 0.5).astype(jnp.float32)

    out = local_mse_loss(yhat, y, mask)
    jax.block_until_ready(out)

    # Reference in plain JAX (matches the PyTorch forward exactly).
    diff = (y * mask) - (yhat * mask)
    ref = jnp.sum(diff * diff) / jnp.sum((mask != 0).astype(jnp.float32))
    assert jnp.allclose(out, ref, rtol=1e-5, atol=1e-5), (out, ref)

    print("KERNEL_OK")
</pallas_src>

<mosaic_0001>
module attributes {stable_mosaic.version = 11 : i64} {
  func.func @_local_mse_kernel(%arg0: i32, %arg1: i32, %arg2: memref<4x512xf32, #tpu.memory_space<vmem>>, %arg3: memref<4x512xf32, #tpu.memory_space<vmem>>, %arg4: memref<4x512xf32, #tpu.memory_space<vmem>>, %arg5: memref<1x1x1xf32, #tpu.memory_space<vmem>>, %arg6: memref<1x1x1xf32, #tpu.memory_space<vmem>>, %arg7: memref<4x512xf32, #tpu.memory_space<vmem>>, %arg8: memref<4x512xf32, #tpu.memory_space<vmem>>) attributes {dimension_semantics = [#tpu.dimension_semantics<parallel>, #tpu.dimension_semantics<arbitrary>], iteration_bounds = array<i64: 2, 1>, scalar_prefetch = 0 : i64, scratch_operands = 2 : i64, tpu.core_type = #tpu.core_type<tc>, window_params = [{transform_indices = @transform_0, window_bounds = array<i64: 4, 512>}, {transform_indices = @transform_1, window_bounds = array<i64: 4, 512>}, {transform_indices = @transform_2, window_bounds = array<i64: 4, 512>}, {transform_indices = @transform_3, window_bounds = array<i64: 1, 1, 1>}, {transform_indices = @transform_4, window_bounds = array<i64: 1, 1, 1>}]} {
    %c0_i32 = arith.constant 0 : i32
    %0 = arith.cmpi eq, %arg1, %c0_i32 : i32
    %1 = arith.extui %0 : i1 to i32
    %c0_i32_0 = arith.constant 0 : i32
    %2 = arith.cmpi ne, %1, %c0_i32_0 : i32
    scf.if %2 {
      %cst_20 = arith.constant 0.000000e+00 : f32
      %37 = vector.broadcast %cst_20 : f32 to vector<4x512xf32>
      %c0_21 = arith.constant 0 : index
      %c0_22 = arith.constant 0 : index
      %38 = vector.load %arg7[%c0_21, %c0_22] : memref<4x512xf32, #tpu.memory_space<vmem>>, vector<4x512xf32>
      tpu.vector_store %arg7[%c0_21, %c0_22], %37 {strides = array<i32>} : memref<4x512xf32, #tpu.memory_space<vmem>>, vector<4x512xf32>,
      %cst_23 = arith.constant 0.000000e+00 : f32
      %39 = vector.broadcast %cst_23 : f32 to vector<4x512xf32>
      %c0_24 = arith.constant 0 : index
      %c0_25 = arith.constant 0 : index
      %40 = vector.load %arg8[%c0_24, %c0_25] : memref<4x512xf32, #tpu.memory_space<vmem>>, vector<4x512xf32>
      tpu.vector_store %arg8[%c0_24, %c0_25], %39 {strides = array<i32>} : memref<4x512xf32, #tpu.memory_space<vmem>>, vector<4x512xf32>,
    } else {
    }
    %c0 = arith.constant 0 : index
    %c0_1 = arith.constant 0 : index
    %3 = vector.load %arg4[%c0, %c0_1] : memref<4x512xf32, #tpu.memory_space<vmem>>, vector<4x512xf32>
    %c0_2 = arith.constant 0 : index
    %c0_3 = arith.constant 0 : index
    %4 = vector.load %arg3[%c0_2, %c0_3] : memref<4x512xf32, #tpu.memory_space<vmem>>, vector<4x512xf32>
    %c0_4 = arith.constant 0 : index
    %c0_5 = arith.constant 0 : index
    %5 = vector.load %arg2[%c0_4, %c0_5] : memref<4x512xf32, #tpu.memory_space<vmem>>, vector<4x512xf32>
    %6 = arith.subf %4, %5 : vector<4x512xf32>
    %7 = arith.mulf %6, %3 : vector<4x512xf32>
    %cst = arith.constant 0.000000e+00 : f32
    %8 = vector.broadcast %cst : f32 to vector<4x512xf32>
    %9 = arith.cmpf one, %3, %8 : vector<4x512xf32>
    %c1_i32 = arith.constant 1 : i32
    %10 = arith.muli %arg0, %c1_i32 : i32
    %11 = arith.addi %10, %arg1 : i32
    %12 = tpu.iota {dimensions = array<i32: 0>} : vector<4x512xi32>
    %c4_i32 = arith.constant 4 : i32
    %13 = arith.muli %11, %c4_i32 : i32
    %14 = vector.broadcast %13 : i32 to vector<4x512xi32>
    %15 = arith.addi %12, %14 : vector<4x512xi32>
    %c4_i32_6 = arith.constant 4 : i32
    %16 = vector.broadcast %c4_i32_6 : i32 to vector<4x512xi32>
    %17 = arith.cmpi slt, %15, %16 : vector<4x512xi32>
    %cst_7 = arith.constant 0.000000e+00 : f32
    %18 = vector.broadcast %cst_7 : f32 to vector<4x512xf32>
    %19 = arith.select %17, %7, %18 : vector<4x512xi1>, vector<4x512xf32>
    %20 = arith.andi %17, %9 : vector<4x512xi1>
    %21 = arith.mulf %19, %19 : vector<4x512xf32>
    %22 = arith.extui %20 : vector<4x512xi1> to vector<4x512xi32>
    %23 = arith.sitofp %22 : vector<4x512xi32> to vector<4x512xf32>
    %c0_8 = arith.constant 0 : index
    %c0_9 = arith.constant 0 : index
    %24 = vector.load %arg7[%c0_8, %c0_9] : memref<4x512xf32, #tpu.memory_space<vmem>>, vector<4x512xf32>
    %25 = vector.shape_cast %21 : vector<4x512xf32> to vector<1x4x512xf32>
    %cst_10 = arith.constant dense<0.000000e+00> : vector<4x512xf32>
    %26 = vector.multi_reduction <add>, %25, %cst_10 [0] : vector<1x4x512xf32> to vector<4x512xf32>
    %27 = arith.addf %24, %26 : vector<4x512xf32>
    %c0_11 = arith.constant 0 : index
    %c0_12 = arith.constant 0 : index
    %28 = vector.load %arg7[%c0_11, %c0_12] : memref<4x512xf32, #tpu.memory_space<vmem>>, vector<4x512xf32>
    tpu.vector_store %arg7[%c0_11, %c0_12], %27 {strides = array<i32>} : memref<4x512xf32, #tpu.memory_space<vmem>>, vector<4x512xf32>,
    %c0_13 = arith.constant 0 : index
    %c0_14 = arith.constant 0 : index
    %29 = vector.load %arg8[%c0_13, %c0_14] : memref<4x512xf32, #tpu.memory_space<vmem>>, vector<4x512xf32>
    %30 = vector.shape_cast %23 : vector<4x512xf32> to vector<1x4x512xf32>
    %cst_15 = arith.constant dense<0.000000e+00> : vector<4x512xf32>
    %31 = vector.multi_reduction <add>, %30, %cst_15 [0] : vector<1x4x512xf32> to vector<4x512xf32>
    %32 = arith.addf %29, %31 : vector<4x512xf32>
    %c0_16 = arith.constant 0 : index
    %c0_17 = arith.constant 0 : index
    %33 = vector.load %arg8[%c0_16, %c0_17] : memref<4x512xf32, #tpu.memory_space<vmem>>, vector<4x512xf32>
    tpu.vector_store %arg8[%c0_16, %c0_17], %32 {strides = array<i32>} : memref<4x512xf32, #tpu.memory_space<vmem>>, vector<4x512xf32>,
    %c0_i32_18 = arith.constant 0 : i32
    %34 = arith.cmpi eq, %arg1, %c0_i32_18 : i32
    %35 = arith.extui %34 : i1 to i32
    %c0_i32_19 = arith.constant 0 : i32
    %36 = arith.cmpi ne, %35, %c0_i32_19 : i32
    scf.if %36 {
      %c0_20 = arith.constant 0 : index
      %c0_21 = arith.constant 0 : index
      %37 = vector.load %arg7[%c0_20, %c0_21] : memref<4x512xf32, #tpu.memory_space<vmem>>, vector<4x512xf32>
      %38 = vector.shape_cast %37 : vector<4x512xf32> to vector<1x4x512xf32>
      %cst_22 = arith.constant dense<0.000000e+00> : vector<1xf32>
      %39 = vector.multi_reduction <add>, %38, %cst_22 [1, 2] : vector<1x4x512xf32> to vector<1xf32>
      %40 = vector.shape_cast %39 : vector<1xf32> to vector<1x1x1xf32>
      %41 = vector.extract %40[0, 0, 0] : f32 from vector<1x1x1xf32>
      %42 = vector.broadcast %41 : f32 to vector<1x1x1xf32>
      %c0_23 = arith.constant 0 : index
      %c0_24 = arith.constant 0 : index
      %c0_25 = arith.constant 0 : index
      %43 = vector.load %arg5[%c0_23, %c0_24, %c0_25] : memref<1x1x1xf32, #tpu.memory_space<vmem>>, vector<1x1x1xf32>
      tpu.vector_store %arg5[%c0_23, %c0_24, %c0_25], %42 {strides = array<i32>} : memref<1x1x1xf32, #tpu.memory_space<vmem>>, vector<1x1x1xf32>,
      %c0_26 = arith.constant 0 : index
      %c0_27 = arith.constant 0 : index
      %44 = vector.load %arg8[%c0_26, %c0_27] : memref<4x512xf32, #tpu.memory_space<vmem>>, vector<4x512xf32>
      %45 = vector.shape_cast %44 : vector<4x512xf32> to vector<1x4x512xf32>
      %cst_28 = arith.constant dense<0.000000e+00> : vector<1xf32>
      %46 = vector.multi_reduction <add>, %45, %cst_28 [1, 2] : vector<1x4x512xf32> to vector<1xf32>
      %47 = vector.shape_cast %46 : vector<1xf32> to vector<1x1x1xf32>
      %48 = vector.extract %47[0, 0, 0] : f32 from vector<1x1x1xf32>
      %49 = vector.broadcast %48 : f32 to vector<1x1x1xf32>
      %c0_29 = arith.constant 0 : index
      %c0_30 = arith.constant 0 : index
      %c0_31 = arith.constant 0 : index
      %50 = vector.load %arg6[%c0_29, %c0_30, %c0_31] : memref<1x1x1xf32, #tpu.memory_space<vmem>>, vector<1x1x1xf32>
      tpu.vector_store %arg6[%c0_29, %c0_30, %c0_31], %49 {strides = array<i32>} : memref<1x1x1xf32, #tpu.memory_space<vmem>>, vector<1x1x1xf32>,
    } else {
    }
    return
  }
  func.func @transform_0(%arg0: i32, %arg1: i32) -> (i32, i32) {
    %c1_i32 = arith.constant 1 : i32
    %0 = arith.muli %arg0, %c1_i32 : i32
    %1 = arith.addi %0, %arg1 : i32
    %c0_i32 = arith.constant 0 : i32
    %2 = arith.minsi %1, %c0_i32 : i32
    %c0_i32_0 = arith.constant 0 : i32
    %c0_i32_1 = arith.constant 0 : i32
    return %2, %c0_i32_0 : i32, i32
  }
  func.func @transform_1(%arg0: i32, %arg1: i32) -> (i32, i32) {
    %c1_i32 = arith.constant 1 : i32
    %0 = arith.muli %arg0, %c1_i32 : i32
    %1 = arith.addi %0, %arg1 : i32
    %c0_i32 = arith.constant 0 : i32
    %2 = arith.minsi %1, %c0_i32 : i32
    %c0_i32_0 = arith.constant 0 : i32
    %c0_i32_1 = arith.constant 0 : i32
    return %2, %c0_i32_0 : i32, i32
  }
  func.func @transform_2(%arg0: i32, %arg1: i32) -> (i32, i32) {
    %c1_i32 = arith.constant 1 : i32
    %0 = arith.muli %arg0, %c1_i32 : i32
    %1 = arith.addi %0, %arg1 : i32
    %c0_i32 = arith.constant 0 : i32
    %2 = arith.minsi %1, %c0_i32 : i32
    %c0_i32_0 = arith.constant 0 : i32
    %c0_i32_1 = arith.constant 0 : i32
    return %2, %c0_i32_0 : i32, i32
  }
  func.func @transform_3(%arg0: i32, %arg1: i32) -> (i32, i32, i32) {
    %c0_i32 = arith.constant 0 : i32
    %c0_i32_0 = arith.constant 0 : i32
    %c0_i32_1 = arith.constant 0 : i32
    return %arg0, %c0_i32, %c0_i32_0 : i32, i32, i32
  }
  func.func @transform_4(%arg0: i32, %arg1: i32) -> (i32, i32, i32) {
    %c0_i32 = arith.constant 0 : i32
    %c0_i32_0 = arith.constant 0 : i32
    %c0_i32_1 = arith.constant 0 : i32
    return %arg0, %c0_i32, %c0_i32_0 : i32, i32, i32
  }
}

</mosaic_0001>

<bundles_post_ra>
// kernel: tpu_custom_call.1
= control target key start
LH: loop header
LB: loop body
LE: loop exit
PB: predicated region body
PF: predicated region fallthrough
CT: control target
= control target key end

     0   :  { %10 = vsyncpa [#allocation5], 0  ;;  %s1070_s0 = inlined_call_operand.hbm [shape: f32[4,512], index: 0, kind: input, shape index: {}]   ;;  %s1071_s1 = inlined_call_operand.hbm [shape: f32[4,512], index: 1, kind: input, shape index: {}]   ;;  %s1072_s2 = inlined_call_operand.hbm [shape: f32[4,512], index: 2, kind: input, shape index: {}]   ;;  %s1073_s3 = inlined_call_operand.vmem [shape: f32[2,1,1], index: 3, kind: output, shape index: {0}]   ;;  %s1074_s4 = inlined_call_operand.vmem [shape: f32[2,1,1], index: 4, kind: output, shape index: {1}]  }
   0x1   :  { %12 = vsyncpa [#allocation5 + $0x1], 0 }
   0x2   :  { %13 = vsyncpa [#allocation7], 0 }
   0x3   :  { %15 = vsyncpa [#allocation7 + $0x1], 0  ;;  %s904_s15 = smov 0   ;;  %s906_s16 = smov 0  }
   0x4   :  { %s908_s17 = smov 0   ;;  %s910_s18 = smov 0  }
   0x5   :  { %s912_s19 = smov 0  }
   0x6 LB: > { %s629_s20 = sadd.s32 4294967295, %s872_s19   ;;  %s33_s21 = sadd.s32 1, %s868_s18  ;;  %s872_s19 = sphi %s912_s19, %s21_s19   ;;  %s868_s18 = sphi %s910_s18, %s1090_s18   ;;  %s864_s17 = sphi %s908_s17, %s1089_s17   ;;  %s860_s16 = sphi %s906_s16, %s1060_s16   ;;  %s856_s15 = sphi %s904_s15, %s1088_s15  }
   0x7   : > { %p35_p0 = scmp.ge.s32.totalorder %s33_s21, 2  ;;  %p853_p1 = scmp.ne.s32.totalorder %s860_s16, 0 }
   0x8   : > { %p54_p2 = scmp.eq.s32.totalorder %s872_s19, 0  ;;  %p59_p3 = scmp.ne.s32.totalorder %s860_s16, %s856_s15 }
   0x9   : > { %s1092_s21 = smov (%p35_p0, %s33_s21), 0  ;;  %p60_p4 = scmp.eq.s32.totalorder %s629_s20, 0 }
   0xa   : > { %p55_p5 = por %p853_p1, %p54_p2  ;;  %p680_p7 = scmp.lt.s32.totalorder %s872_s19, 2 }
   0xb   : > { %p936_p6 = por %p60_p4, %p59_p3  ;;  %s221_s24 = sand.u32 1, %s872_s19  }
   0xc   : > { %p941_p8 = pnand %p680_p7, %p55_p5  ;;  %s874_s25 = smov [#allocation6]  }
   0xd   : > { %s1078_s22 = scalar_select %p936_p6, 1, 0 }
   0xe   : > { %s1079_s23 = scalar_select %p941_p8, 1, 0 }
   0xf   : > { %s236_s26 = sshll.u32 %s874_s25, 4  ;;  %s947_s27 = scalar_lea.sflag [#allocation7], %s221_s24  ;;  %s237_s26 = int_to_ptr.vmem [resolvable:$true] %s236_s26 }
  0x10   : > { %s731_s30 = scalar_lea.hbm %s1071_s1, 256  ;;  %p957_p11 = pneg %p941_p8 }
  0x11   : > { %p732_p10 = scmp.ne.s32.totalorder %s1071_s1, %s731_s30  ;;  %p738_p0 = scmp.lt.u32.totalorder %s731_s30, %s731_s30 }
  0x12   : > { %p740_p1 = scmp.lt.u32.totalorder %s731_s30, %s1071_s1 }
  0x13   : > { %p734_p12 = pnand %p957_p11, %p732_p10 }
  0x14   : > { %p741_p2 = por %p740_p1, %p738_p0 }
  0x15   : > { %p735_p13 = pneg %p734_p12 }
  0x17   : > { %p742_p3 = pnand %p741_p2, %p735_p13 }
  0x19   : > { %745 = shalt.err (!%p742_p3)
}
  0x1a   : > { %s746_s10 = scalar_lea.vmem %s237_s26, 256  ;;  %s753_s11 = scalar_lea.vmem %s237_s26, 512 }
  0x1b   : > { %p747_p4 = scmp.ne.s32.totalorder %s237_s26, %s746_s10  ;;  %p754_p9 = scmp.lt.s32.totalorder %s237_s26, %s237_s26 }
  0x1c   : > { %p755_p6 = scmp.lt.s32.totalorder %s753_s11, %s746_s10 }
  0x1d   : > { %p749_p5 = pnand %p747_p4, %p957_p11 }
  0x1e   : > { %p756_p8 = por %p755_p6, %p754_p9 }
  0x1f   : > { %p750_p7 = pneg %p749_p5 }
  0x21   : > { %p757_p10 = pnand %p756_p8, %p750_p7 }
  0x23   : > { %760 = shalt.err (!%p757_p10)
}
  0x24   : > { %p1081_p12 = scmp.ne.s32.totalorder %s1079_s23, 0  ;;  %p263_p13 = scmp.lt.s32.totalorder %s872_s19, 3 }
  0x25   : > { %p1082_p0 = scmp.ge.s32.totalorder %s872_s19, 1  ;;  %s875_s15 = smov [#allocation4]  }
  0x26   : > { %676 = dma.hbm_to_vmem [thread:$0]  (!%p1081_p12), %s1071_s1, 256, %s237_s26, %s947_s27  }
  0x27   : > { %p977_p1 = pnand %p1082_p0, %p263_p13  ;;  %s214_s24 = sshll.u32 %s875_s15, 4  ;;  %s215_s24 = int_to_ptr.vmem [resolvable:$true] %s214_s24 }
  0x28   : > { %s761_s29 = scalar_lea.hbm %s1070_s0, 256 }
  0x29   : > { %s1083_s14 = scalar_select %p977_p1, 1, 0 }
  0x2a   : > { %p762_p6 = scmp.ne.s32.totalorder %s1070_s0, %s761_s29  ;;  %p768_p2 = scmp.lt.u32.totalorder %s761_s29, %s761_s29 }
  0x2b   : > { %p770_p3 = scmp.lt.u32.totalorder %s761_s29, %s1070_s0 }
  0x2c   : > { %p764_p8 = pnand %p762_p6, %p957_p11 }
  0x2d   : > { %p771_p4 = por %p770_p3, %p768_p2 }
  0x2e   : > { %p765_p9 = pneg %p764_p8 }
  0x30   : > { %p772_p5 = pnand %p771_p4, %p765_p9 }
  0x32   : > { %775 = shalt.err (!%p772_p5)
}
  0x33   : > { %s776_s8 = scalar_lea.vmem %s215_s24, 256  ;;  %s783_s9 = scalar_lea.vmem %s215_s24, 512 }
  0x34   : > { %p777_p7 = scmp.ne.s32.totalorder %s215_s24, %s776_s8  ;;  %p784_p0 = scmp.lt.s32.totalorder %s215_s24, %s215_s24 }
  0x35   : > { %p785_p1 = scmp.lt.s32.totalorder %s783_s9, %s776_s8 }
  0x36   : > { %p779_p10 = pnand %p777_p7, %p957_p11 }
  0x37   : > { %p786_p12 = por %p785_p1, %p784_p0 }
  0x38   : > { %p780_p13 = pneg %p779_p10 }
  0x3a   : > { %p787_p6 = pnand %p786_p12, %p780_p13 }
  0x3c   : > { %790 = shalt.err (!%p787_p6)
}
  0x3d   : > { %p1084_p8 = scmp.ne.s32.totalorder %s1079_s23, 0  ;;  %s876_s12 = smov [#allocation8]  }
  0x3e   : > { %s258_s13 = sshll.u32 %s876_s12, 4  ;;  %s791_s28 = scalar_lea.hbm %s1072_s2, 256  ;;  %s259_s13 = int_to_ptr.vmem [resolvable:$true] %s258_s13 }
  0x3f   : > { %673 = dma.hbm_to_vmem [thread:$0]  (!%p1084_p8), %s1070_s0, 256, %s215_s24, [#allocation5]  }
  0x40   : > { %p792_p1 = scmp.ne.s32.totalorder %s1072_s2, %s791_s28  ;;  %p798_p2 = scmp.lt.u32.totalorder %s791_s28, %s791_s28 }
  0x41   : > { %p800_p3 = scmp.lt.u32.totalorder %s791_s28, %s1072_s2 }
  0x42   : > { %p794_p12 = pnand %p792_p1, %p957_p11 }
  0x43   : > { %p801_p4 = por %p800_p3, %p798_p2 }
  0x44   : > { %p795_p9 = pneg %p794_p12 }
  0x46   : > { %p802_p5 = pnand %p801_p4, %p795_p9 }
  0x48   : > { %805 = shalt.err (!%p802_p5)
}
  0x49   : > { %s806_s24 = scalar_lea.vmem %s259_s13, 256  ;;  %s813_s6 = scalar_lea.vmem %s259_s13, 512 }
  0x4a   : > { %p807_p7 = scmp.ne.s32.totalorder %s259_s13, %s806_s24  ;;  %p814_p0 = scmp.lt.s32.totalorder %s259_s13, %s259_s13 }
  0x4b   : > { %p815_p6 = scmp.lt.s32.totalorder %s813_s6, %s806_s24 }
  0x4c   : > { %p809_p10 = pnand %p807_p7, %p957_p11 }
  0x4d   : > { %p816_p8 = por %p815_p6, %p814_p0 }
  0x4e   : > { %p810_p13 = pneg %p809_p10 }
  0x50   : > { %p817_p1 = pnand %p816_p8, %p810_p13 }
  0x52   : > { %820 = shalt.err (!%p817_p1)
}
  0x53   : > { %p1085_p12 = scmp.ne.s32.totalorder %s1079_s23, 0  ;;  %p1086_p9 = scmp.ne.s32.totalorder %s1083_s14, 0 }
  0x54   : > { %s269_s7 = sand.u32 (!%p1086_p9), 1, %s860_s16   ;;  %p1087_p11 = scmp.ne.s32.totalorder (!%p1086_p9), %s1078_s22, 0 }
  0x55   : > { %679 = dma.hbm_to_vmem [thread:$0]  (!%p1085_p12), %s1072_s2, 256, %s259_s13, %s947_s27  }
  0x56   : > { %267 = sbr.rel (%p1086_p9) target bundleno = 328 (0x148), region = 32  ;;  %s643_s10 = sshll.u32 (!%p1086_p9), %s269_s7, 4 }
  0x57   : > { %s270_s11 = scalar_lea.sflag (!%p1086_p9), [#allocation5], %s269_s7  ;;  %s273_s12 = scalar_lea.vmem (!%p1086_p9), [#allocation4], %s643_s10 }
  0x5d   : > { %846 = dma.done.wait (%p1087_p11), %s270_s11, 256  }
  0x5e   : > { %848 = vsyncadd (%p1087_p11), %s270_s11, 4294967040  ;;  %s278_s23 = sand.u32 1, %s629_s20   ;;  %s282_s27 = scalar_lea.vmem [#allocation6], %s643_s10 }
  0x5f   : > { %s279_s15 = scalar_lea.sflag [#allocation7], %s278_s23 }
  0x60   : > { %850 = dma.done.wait (%p1087_p11), %s279_s15, 512  }
  0x61   : > { %852 = vsyncadd (%p1087_p11), %s279_s15, 4294966784  ;;  %v363_v0 = vlaneseq  ;;  %s646_s14 = sshll.u32 %s864_s17, 2  ;;  %s291_s13 = scalar_lea.vmem [#allocation8], %s643_s10  ;;  %v352_v6 = vld [vmem:[%s282_s27] sm:$0xff]  ;;  %v353_v7 = vld [vmem:[%s282_s27 + $0x8] sm:$0xff]  ;;  %v877_v12 = vmov 0  }
  0x62   : > { %v366_v1 = vstv %s646_s14  ;;  %v350_v4 = vld [vmem:[%s291_s13] sm:$0xff]  ;;  %v351_v5 = vld [vmem:[%s291_s13 + $0x8] sm:$0xff]  ;;  %v878_v19 = vmov 0.0   ;;  %vm448_vm8 = vcmask 1043456   ;;  %p336_p8 = scmp.lt.s32.totalorder %s864_s17, 1  ;;  %vm466_vm10 = vcmask 0  }
  0x63   : > { %v364_v2 = vshrl.u32 %v363_v0, 7  ;;  %v354_v8 = vld [vmem:[%s273_s12] sm:$0xff]  ;;  %v355_v9 = vld [vmem:[%s273_s12 + $0x8] sm:$0xff]  ;;  %vm360_vm1 = vcmp.ne.f32.partialorder %v350_v4, 0.0  ;;  %vm361_vm2 = vcmp.ne.f32.partialorder %v351_v5, 0.0 }
  0x64   : > { %v356_v10 = vsub.f32 %v352_v6, %v354_v8  ;;  %v357_v11 = vsub.f32 %v353_v7, %v355_v9  ;;  %v379_v13 = vsel %vm360_vm1, 1, %v877_v12  ;;  %v380_v14 = vsel %vm361_vm2, 1, %v877_v12  ;;  %s1094_s17 = smov (!%p336_p8, %s864_s17), 1 }
  0x65   : > { %v367_v3 = vadd.s32 %v366_v1, %v364_v2  ;;  %v381_v15 = vcombine.high %v379_v13, %v379_v13  ;;  %v382_v16 = vcombine.high %v380_v14, %v380_v14  ;;  %s338_s25 = scalar_lea.vmem %s1073_s3, %s1094_s17  ;;  %s341_s5 = scalar_lea.vmem %s1074_s4, %s1094_s17 }
  0x66   : > { %v358_v17 = vmul.f32 %v356_v10, %v350_v4  ;;  %v359_v18 = vmul.f32 %v357_v11, %v351_v5 }
  0x67   : > { %vm368_vm0 = vcmp.lt.s32.totalorder %v367_v3, 4  ;;  %vm383_vm5 = vcmp.ne.s32.totalorder %v381_v15, 0  ;;  %vm384_vm6 = vcmp.ne.s32.totalorder %v382_v16, 0 }
  0x68   : > { %vm385_vm3 = vmand %vm368_vm0, %vm360_vm1  ;;  %v371_v22 = vcombine.high %v358_v17, %v358_v17  ;;  %v372_v23 = vcombine.high %v359_v18, %v359_v18  ;;  %v375_v24 = vsel %vm368_vm0, %v358_v17, 0.0  ;;  %v377_v25 = vsel %vm368_vm0, %v359_v18, 0.0 }
  0x69   : > { %vm387_vm4 = vmand %vm368_vm0, %vm361_vm2  ;;  %v647_v20 = vsel %vm385_vm3, 1.0, %v878_v19  ;;  %v389_v26 = vmul.f32 %v375_v24, %v375_v24  ;;  %v391_v27 = vmul.f32 %v377_v25, %v377_v25 }
  0x6a   : > { %v649_v21 = vsel %vm387_vm4, 1.0, %v878_v19  ;;  %vm386_vm7 = vmand %vm368_vm0, %vm383_vm5  ;;  %v376_v29 = vsel %vm368_vm0, %v371_v22, 0.0  ;;  %v378_v30 = vsel %vm368_vm0, %v372_v23, 0.0 }
  0x6b   : > { %vm388_vm9 = vmand %vm368_vm0, %vm384_vm6  ;;  %v648_v28 = vsel %vm386_vm7, 1.0, %v878_v19  ;;  %v390_v33 = vmul.f32 %v376_v29, %v376_v29  ;;  %v392_v34 = vmul.f32 %v378_v30, %v378_v30 }
  0x6c   : > { %v650_v31 = vsel %vm388_vm9, 1.0, %v878_v19  ;;  %v429_v32 = vcombine.low %v647_v20, %v648_v28  ;;  %v658_v36 = vcombine.low %v648_v28, %v648_v28 }
  0x6d   : > { %v430_v35 = vcombine.low %v649_v21, %v650_v31  ;;  %v411_v38 = vcombine.low %v389_v26, %v390_v33  ;;  %v412_v39 = vcombine.low %v391_v27, %v392_v34  ;;  %v656_v40 = vcombine.low %v390_v33, %v390_v33 }
  0x6e   : > { %v476_v37 = vsel %vm448_vm8, %v429_v32, 0.0  ;;  %v657_v41 = vcombine.low %v392_v34, %v392_v34  ;;  %v659_v42 = vcombine.low %v650_v31, %v650_v31  ;;  %v477_v43 = vsel %vm448_vm8, %v658_v36, 0.0 }
  0x6f   : > { %v449_v44 = vsel %vm448_vm8, %v411_v38, 0.0  ;;  %v450_v45 = vsel %vm448_vm8, %v656_v40, 0.0  ;;  %v452_v46 = vsel %vm448_vm8, %v412_v39, 0.0  ;;  %v479_v47 = vsel %vm448_vm8, %v430_v35, 0.0 }
  0x70   : > { %v451_v48 = vadd.f32 %v450_v45, %v449_v44  ;;  %v478_v49 = vadd.f32 %v477_v43, %v476_v37  ;;  %v454_v50 = vsel %vm448_vm8, %v657_v41, 0.0  ;;  %v481_v53 = vsel %vm448_vm8, %v659_v42, 0.0 }
  0x72   : > { %v453_v51 = vadd.f32 %v452_v46, %v451_v48  ;;  %v480_v52 = vadd.f32 %v479_v47, %v478_v49 }
  0x74   : > { %v455_v54 = vadd.f32 %v454_v50, %v453_v51  ;;  %v482_v55 = vadd.f32 %v481_v53, %v480_v52 }
  0x76   : > { %456 = vadd.xlane.f32.xlu0 %v455_v54 }
  0x7a   : > { %483 = vadd.xlane.f32.xlu0 %v482_v55 }
 0x103   : > { %v457_v56 = vpop.xlane.xlu0 %456 }
 0x104   : > { %v458_v57 = vrot.slane %v457_v56, 4 }
 0x106   : > { %v459_v58 = vadd.f32 %v458_v57, %v457_v56 }
 0x107   : > { %v484_v59 = vpop.xlane.xlu0 %483 }
 0x108   : > { %v460_v60 = vrot.slane %v459_v58, 2  ;;  %v485_v61 = vrot.slane %v484_v59, 4 }
 0x10a   : > { %v486_v62 = vadd.f32 %v485_v61, %v484_v59  ;;  %v461_v63 = vadd.f32 %v460_v60, %v459_v58 }
 0x10c   : > { %v487_v0 = vrot.slane %v486_v62, 2  ;;  %v462_v1 = vrot.slane %v461_v63, 1 }
 0x10e   : > { %v488_v2 = vadd.f32 %v487_v0, %v486_v62  ;;  %v463_v3 = vadd.f32 %v462_v1, %v461_v63 }
 0x110   : > { %660 = vpush %v463_v3  ;;  %v489_v4 = vrot.slane %v488_v2, 1 }
 0x112   : > { %v490_v5 = vadd.f32 %v489_v4, %v488_v2 }
 0x114   : > { %662 = vpush %v490_v5 }
 0x141   : > { %s661_s28 = spop %660 }
 0x142   : > { %v465_v6 = vstv %s661_s28 }
 0x143   : > { %467 = vst.msk [vmem:[%s338_s25] sm:$0x1] %vm466_vm10, %v465_v6 }
 0x145   : > { %s663_s26 = spop %662 }
 0x146   : > { %v492_v7 = vstv %s663_s26 }
 0x147   : > { %493 = vst.msk [vmem:[%s341_s5] sm:$0x1] %vm466_vm10, %v492_v7 }
 0x148 PF: > { %s21_s19 = sadd.s32 1, %s872_s19   ;;  %s1088_s15 = smov %s860_s16 }
 0x149   : > { %p18_p2 = scmp.ge.s32.totalorder %s21_s19, 4   ;;  %s1060_s16 = smov 0  }
 0x14a   : > { %s1089_s17 = smov %s868_s18  ;;  %s1090_s18 = smov %s1092_s21 }
 0x14b   :  { %20 = sbr.rel (!%p18_p2) target bundleno = 6 (0x6), region = 116 }
 0x152   :  { %523 = vsyncpa [#allocation5], 1 }
 0x153   :  { %525 = vsyncpa [#allocation5 + $0x1], 1 }
 0x154   :  { %526 = vsyncpa [#allocation7], 1 }
 0x155   :  { %528 = vsyncpa [#allocation7 + $0x1], 1 }

</bundles_post_ra>
